<compile_context>
chip_gen: v5e
topology: v5e:2x2
jax: 0.10.0
libtpu: 0.0.40
codegen_flags: <defaults>
</compile_context>

<pallas_src>
import jax
import jax.numpy as jnp
from jax.experimental import pallas as pl
from jax.experimental.pallas import tpu as pltpu


def _reghead_kernel(x_ref, w_ref, b_ref, o_ref, acc_ref):
    # x_ref:   (TB, TK)        flattened activations tile
    # w_ref:   (TK, out_dims)  pre-scaled / pre-expanded weight tile
    # b_ref:   (1, out_dims)   bias (resident)
    # o_ref:   (TB, out_dims)  output tile
    # acc_ref: (TB, out_dims)  f32 accumulator, resident across the K axis
    k = pl.program_id(1)

    @pl.when(k == 0)
    def _init():
        acc_ref[...] = jnp.zeros_like(acc_ref)

    # Pool + linear fused into a single MXU matmul (weights carry the 1/HW
    # scale and the spatial replication, built once in the glue).
    acc_ref[...] += jnp.dot(x_ref[...], w_ref[...],
                            preferred_element_type=jnp.float32)

    @pl.when(k == pl.num_programs(1) - 1)
    def _finalize():
        o_ref[...] = (acc_ref[...] + b_ref[...].astype(jnp.float32)).astype(o_ref.dtype)


def _pick_tile(dim, quantum, max_tile):
    """Largest multiple of `quantum` that divides `dim` and is <= max_tile.

    Falls back to the full extent (always a legal block shape) if none exists.
    """
    if dim <= max_tile:
        return dim
    t = (max_tile // quantum) * quantum
    while t >= quantum:
        if dim % t == 0:
            return t
        t -= quantum
    return dim


def reg_head_forward(x, weight, bias, *, tb=None, tk=None,
                     vmem_limit_bytes=32 * 1024 * 1024):
    """RegHead forward (inference path, target=None).

    x      : (B, C, H, W) activations (or a list/tuple -> last element is used)
    weight : (out_dims, C)  PyTorch nn.Linear convention
    bias   : (out_dims,)
    returns: (B, out_dims)
    """
    if isinstance(x, (list, tuple)):
        x = x[-1]
    B, C, H, W = x.shape
    out_dims = weight.shape[0]
    HW = H * W
    K = C * HW

    # Free, contiguous reshape: x_flat[b, c*HW + h] == x[b, c, h//W, h%W].
    x_flat = x.reshape(B, K)

    # Fold the 1/HW pooling scale into the (tiny) weight and replicate it along
    # the spatial axis so the pooled-mean + Linear collapse into one matmul.
    w_exp = jnp.broadcast_to((weight.T / HW)[:, None, :], (C, HW, out_dims))
    w_exp = w_exp.reshape(K, out_dims).astype(x_flat.dtype)
    b2 = bias.reshape(1, out_dims)

    itemsize = jnp.dtype(x_flat.dtype).itemsize

    # Batch tile: multiple of 8 (sublane quantum) dividing B, capped at 256.
    if tb is None:
        tb = _pick_tile(B, 8, 256)
    # Contraction tile: multiple of 128 (lane quantum) dividing K, sized so a
    # single x tile stays <= ~4 MiB (double-buffered pair <= ~8 MiB).
    if tk is None:
        tk_budget = max(128, (4 * 1024 * 1024) // (tb * itemsize))
        tk = _pick_tile(K, 128, tk_budget)

    grid = (pl.cdiv(B, tb), pl.cdiv(K, tk))

    cost = pl.CostEstimate(
        flops=2 * B * K * out_dims,
        transcendentals=0,
        bytes_accessed=(B * K + K * out_dims + B * out_dims) * itemsize,
    )

    return pl.pallas_call(
        _reghead_kernel,
        out_shape=jax.ShapeDtypeStruct((B, out_dims), x.dtype),
        grid_spec=pltpu.PrefetchScalarGridSpec(
            num_scalar_prefetch=0,
            grid=grid,
            in_specs=[
                pl.BlockSpec((tb, tk), lambda i, k: (i, k)),         # activations stream
                pl.BlockSpec((tk, out_dims), lambda i, k: (k, 0)),   # expanded weight
                pl.BlockSpec((1, out_dims), lambda i, k: (0, 0)),    # bias (resident)
            ],
            out_specs=pl.BlockSpec((tb, out_dims), lambda i, k: (i, 0)),
            scratch_shapes=[pltpu.VMEM((tb, out_dims), jnp.float32)],
        ),
        compiler_params=pltpu.CompilerParams(
            dimension_semantics=("parallel", "arbitrary"),
            vmem_limit_bytes=vmem_limit_bytes,
        ),
        cost_estimate=cost,
    )(x_flat, w_exp, b2)


if __name__ == "__main__":
    key = jax.random.PRNGKey(0)
    k_x, k_w, k_b = jax.random.split(key, 3)

    B, C, H, W = 2, 4, 16, 16
    out_dims = 8

    x = jax.random.normal(k_x, (B, C, H, W), dtype=jnp.float32)
    # Deterministic synthetic parameters (shapes match nn.Linear(in_channels=C, out_dims)).
    weight = jax.random.normal(k_w, (out_dims, C), dtype=jnp.float32) * 0.1
    bias = jax.random.normal(k_b, (out_dims,), dtype=jnp.float32) * 0.1

    # tk=512 forces 2 steps along the K (= C*H*W = 1024) reduction axis so the
    # accumulator / init / finalize path is exercised even at demo shapes.
    pred = reg_head_forward(x, weight, bias, tk=512)
    pred = jax.block_until_ready(pred)

    # Reference check in plain JAX.
    pooled_ref = jnp.mean(x.reshape(B, C, -1), axis=-1)
    ref = pooled_ref @ weight.T + bias
    assert jnp.allclose(pred, ref, atol=1e-4, rtol=1e-4), "mismatch vs reference"

    # TODO(synk): training branch (smooth_l1_loss against `target`) not implemented;
    # only the inference (target=None) path is translated.
    print("KERNEL_OK")
</pallas_src>

<mosaic_0001>
module attributes {stable_mosaic.version = 11 : i64} {
  func.func @_reghead_kernel(%arg0: i32, %arg1: i32, %arg2: memref<2x512xf32, #tpu.memory_space<vmem>>, %arg3: memref<512x8xf32, #tpu.memory_space<vmem>>, %arg4: memref<1x8xf32, #tpu.memory_space<vmem>>, %arg5: memref<2x8xf32, #tpu.memory_space<vmem>>, %arg6: memref<2x8xf32, #tpu.memory_space<vmem>>) attributes {dimension_semantics = [#tpu.dimension_semantics<parallel>, #tpu.dimension_semantics<arbitrary>], iteration_bounds = array<i64: 1, 2>, scalar_prefetch = 0 : i64, scratch_operands = 1 : i64, tpu.core_type = #tpu.core_type<tc>, window_params = [{transform_indices = @transform_0, window_bounds = array<i64: 2, 512>}, {transform_indices = @transform_1, window_bounds = array<i64: 512, 8>}, {pipeline_mode = #tpu.pipeline_mode<synchronous>, transform_indices = @transform_2, window_bounds = array<i64: 1, 8>}, {transform_indices = @transform_3, window_bounds = array<i64: 2, 8>}]} {
    %c0_i32 = arith.constant 0 : i32
    %0 = arith.cmpi eq, %arg1, %c0_i32 : i32
    %1 = arith.extui %0 : i1 to i32
    %c0_i32_0 = arith.constant 0 : i32
    %2 = arith.cmpi ne, %1, %c0_i32_0 : i32
    scf.if %2 {
      %cst_9 = arith.constant 0.000000e+00 : f32
      %12 = vector.broadcast %cst_9 : f32 to vector<2x8xf32>
      %c0_10 = arith.constant 0 : index
      %c0_11 = arith.constant 0 : index
      %13 = vector.load %arg6[%c0_10, %c0_11] : memref<2x8xf32, #tpu.memory_space<vmem>>, vector<2x8xf32>
      tpu.vector_store %arg6[%c0_10, %c0_11], %12 {strides = array<i32>} : memref<2x8xf32, #tpu.memory_space<vmem>>, vector<2x8xf32>,
    } else {
    }
    %c0 = arith.constant 0 : index
    %c0_1 = arith.constant 0 : index
    %3 = vector.load %arg6[%c0, %c0_1] : memref<2x8xf32, #tpu.memory_space<vmem>>, vector<2x8xf32>
    %c0_2 = arith.constant 0 : index
    %c0_3 = arith.constant 0 : index
    %4 = vector.load %arg2[%c0_2, %c0_3] : memref<2x512xf32, #tpu.memory_space<vmem>>, vector<2x512xf32>
    %c0_4 = arith.constant 0 : index
    %c0_5 = arith.constant 0 : index
    %5 = vector.load %arg3[%c0_4, %c0_5] : memref<512x8xf32, #tpu.memory_space<vmem>>, vector<512x8xf32>
    %cst = arith.constant dense<0.000000e+00> : vector<2x8xf32>
    %6 = tpu.matmul %4, %5, %cst {dimension_numbers = #tpu.dot_dimension_numbers<[1], [0], [0], [1], [0, 0, 1, 1], [], []>} : vector<2x512xf32>, vector<512x8xf32>, vector<2x8xf32> -> vector<2x8xf32>
    %7 = arith.addf %3, %6 : vector<2x8xf32>
    %c0_6 = arith.constant 0 : index
    %c0_7 = arith.constant 0 : index
    %8 = vector.load %arg6[%c0_6, %c0_7] : memref<2x8xf32, #tpu.memory_space<vmem>>, vector<2x8xf32>
    tpu.vector_store %arg6[%c0_6, %c0_7], %7 {strides = array<i32>} : memref<2x8xf32, #tpu.memory_space<vmem>>, vector<2x8xf32>,
    %c1_i32 = arith.constant 1 : i32
    %9 = arith.cmpi eq, %arg1, %c1_i32 : i32
    %10 = arith.extui %9 : i1 to i32
    %c0_i32_8 = arith.constant 0 : i32
    %11 = arith.cmpi ne, %10, %c0_i32_8 : i32
    scf.if %11 {
      %c0_9 = arith.constant 0 : index
      %c0_10 = arith.constant 0 : index
      %12 = vector.load %arg6[%c0_9, %c0_10] : memref<2x8xf32, #tpu.memory_space<vmem>>, vector<2x8xf32>
      %c0_11 = arith.constant 0 : index
      %c0_12 = arith.constant 0 : index
      %13 = vector.load %arg4[%c0_11, %c0_12] : memref<1x8xf32, #tpu.memory_space<vmem>>, vector<1x8xf32>
      %14 = vector.broadcast %13 : vector<1x8xf32> to vector<2x8xf32>
      %15 = arith.addf %12, %14 : vector<2x8xf32>
      %c0_13 = arith.constant 0 : index
      %c0_14 = arith.constant 0 : index
      %16 = vector.load %arg5[%c0_13, %c0_14] : memref<2x8xf32, #tpu.memory_space<vmem>>, vector<2x8xf32>
      tpu.vector_store %arg5[%c0_13, %c0_14], %15 {strides = array<i32>} : memref<2x8xf32, #tpu.memory_space<vmem>>, vector<2x8xf32>,
    } else {
    }
    return
  }
  func.func @transform_0(%arg0: i32, %arg1: i32) -> (i32, i32) {
    %c0_i32 = arith.constant 0 : i32
    return %arg0, %arg1 : i32, i32
  }
  func.func @transform_1(%arg0: i32, %arg1: i32) -> (i32, i32) {
    %c0_i32 = arith.constant 0 : i32
    %c0_i32_0 = arith.constant 0 : i32
    return %arg1, %c0_i32 : i32, i32
  }
  func.func @transform_2(%arg0: i32, %arg1: i32) -> (i32, i32) {
    %c0_i32 = arith.constant 0 : i32
    %c0_i32_0 = arith.constant 0 : i32
    %c0_i32_1 = arith.constant 0 : i32
    return %c0_i32, %c0_i32_0 : i32, i32
  }
  func.func @transform_3(%arg0: i32, %arg1: i32) -> (i32, i32) {
    %c0_i32 = arith.constant 0 : i32
    %c0_i32_0 = arith.constant 0 : i32
    return %arg0, %c0_i32 : i32, i32
  }
}

</mosaic_0001>

<bundles_post_ra>
// kernel: tpu_custom_call.1
= control target key start
LH: loop header
LB: loop body
LE: loop exit
PB: predicated region body
PF: predicated region fallthrough
CT: control target
= control target key end

     0   :  { %8 = vsyncpa [#allocation4], 0  ;;  %s592_s12 = smov 0   ;;  %s594_s13 = smov 0   ;;  %s709_s0 = inlined_call_operand.vmem [shape: f32[2,1024], index: 0, kind: input, shape index: {}]   ;;  %s710_s1 = inlined_call_operand.vmem [shape: f32[1024,8], index: 1, kind: input, shape index: {}]   ;;  %s711_s2 = inlined_call_operand.vmem [shape: f32[1,8], index: 2, kind: input, shape index: {}]   ;;  %s712_s3 = inlined_call_operand.hbm [shape: f32[2,8], index: 3, kind: output, shape index: {}]  }
   0x1   :  { %s596_s14 = smov 0  }
   0x2 LB: > { %s467_s15 = sadd.s32 4294967295, %s568_s14   ;;  %s23_s16 = sadd.s32 1, %s564_s13  ;;  %s568_s14 = sphi %s596_s14, %s14_s14   ;;  %s564_s13 = sphi %s594_s13, %s714_s13   ;;  %s560_s12 = sphi %s592_s12, %s713_s12  }
   0x3   : > { %p24_p0 = scmp.ge.s32.totalorder %s23_s16, 2  ;;  %p470_p1 = scmp.ge.s32.totalorder %s568_s14, 1 }
   0x4   : > { %p168_p2 = scmp.lt.s32.totalorder %s568_s14, 3 }
   0x5   : > { %s716_s16 = smov (%p24_p0, %s23_s16), 0 }
   0x6   : > { %p169_p3 = pnand %p470_p1, %p168_p2 }
   0x7   : > { %s471_s17 = sshll.u32 (!%p169_p3), %s560_s12, 2  ;;  %s473_s18 = sshll.u32 (!%p169_p3), %s560_s12, 6 }
   0x8   : > { %172 = sbr.rel (%p169_p3) target bundleno = 211 (0xd3), region = 32  ;;  %p199_p4 = scmp.lt.s32.totalorder (!%p169_p3), %s471_s17, 7 }
   0x9   : > { %p207_p5 = scmp.lt.s32.totalorder (!%p169_p3), %s473_s18, 127  ;;  %p475_p6 = scmp.ne.s32.totalorder (!%p169_p3), %s560_s12, 0 }
   0xd   : > { %s718_s17 = smov (!%p199_p4, %s471_s17), 7  ;;  %s720_s18 = smov (!%p207_p5, %s473_s18), 127 }
   0xe   : > { %s472_s19 = sshll.u32 %s718_s17, 1  ;;  %s474_s23 = sshll.u32 %s720_s18, 3 }
   0xf   : > { %s618_s22 = scalar_lea.vmem %s709_s0, %s472_s19  ;;  %s623_s26 = scalar_lea.vmem %s710_s1, %s474_s23 }
  0x10   : > { %215 = sbr.rel (%p475_p6) target bundleno = 23 (0x17), region = 36 }
  0x15   : > { %vm216_vm0 = vcmask 58368   ;;  %v570_v0 = vmov 0.0  }
  0x16   : > { %217 = vst.msk [vmem:[#allocation2] sm:$0x3] %vm216_vm0, %v570_v0 }
  0x17 PF: > { %v267_v1 = vld [vmem:[%s623_s26 + $0x178] sm:$0xff]  ;;  %v266_v2 = vld [vmem:[%s623_s26 + $0x170] sm:$0xff]  ;;  %v265_v6 = vld [vmem:[%s623_s26 + $0x168] sm:$0xff]  ;;  %vm375_vm1 = vcmask 58368   ;;  %p476_p7 = scmp.ne.s32.totalorder %s560_s12, 1 }
  0x18   : > { %v283_v3 = vld [vmem:[%s623_s26 + $0x1f8] sm:$0xff]  ;;  %334 = vmatpush.msra.mxu2 %v267_v1  ;;  %v282_v7 = vld [vmem:[%s623_s26 + $0x1f0] sm:$0xff]  ;;  %v281_v10 = vld [vmem:[%s623_s26 + $0x1e8] sm:$0xff] }
  0x19   : > { %354 = vmatpush.msra.mxu3 %v283_v3  ;;  %v235_v4 = vld [vmem:[%s623_s26 + $0x78] sm:$0xff]  ;;  %v234_v8 = vld [vmem:[%s623_s26 + $0x70] sm:$0xff]  ;;  %v233_v11 = vld [vmem:[%s623_s26 + $0x68] sm:$0xff] }
  0x1a   : > { %v251_v5 = vld [vmem:[%s623_s26 + $0xf8] sm:$0xff]  ;;  %294 = vmatpush.msra.mxu0 %v235_v4  ;;  %v250_v9 = vld [vmem:[%s623_s26 + $0xf0] sm:$0xff]  ;;  %335 = vmatpush.msra.mxu2 %v266_v2  ;;  %v264_v12 = vld [vmem:[%s623_s26 + $0x160] sm:$0xff] }
  0x1b   : > { %314 = vmatpush.msra.mxu1 %v251_v5  ;;  %355 = vmatpush.msra.mxu3 %v282_v7  ;;  %v249_v13 = vld [vmem:[%s623_s26 + $0xe8] sm:$0xff]  ;;  %v280_v14 = vld [vmem:[%s623_s26 + $0x1e0] sm:$0xff]  ;;  %v263_v17 = vld [vmem:[%s623_s26 + $0x158] sm:$0xff] }
  0x1c   : > { %295 = vmatpush.msra.mxu0 %v234_v8  ;;  %336 = vmatpush.msra.mxu2 %v265_v6  ;;  %v232_v15 = vld [vmem:[%s623_s26 + $0x60] sm:$0xff]  ;;  %v279_v18 = vld [vmem:[%s623_s26 + $0x1d8] sm:$0xff]  ;;  %v262_v21 = vld [vmem:[%s623_s26 + $0x150] sm:$0xff] }
  0x1d   : > { %315 = vmatpush.msra.mxu1 %v250_v9  ;;  %356 = vmatpush.msra.mxu3 %v281_v10  ;;  %v248_v16 = vld [vmem:[%s623_s26 + $0xe0] sm:$0xff]  ;;  %v231_v19 = vld [vmem:[%s623_s26 + $0x58] sm:$0xff]  ;;  %v278_v22 = vld [vmem:[%s623_s26 + $0x1d0] sm:$0xff] }
  0x1e   : > { %296 = vmatpush.msra.mxu0 %v233_v11  ;;  %337 = vmatpush.msra.mxu2 %v264_v12  ;;  %v247_v20 = vld [vmem:[%s623_s26 + $0xd8] sm:$0xff]  ;;  %v230_v23 = vld [vmem:[%s623_s26 + $0x50] sm:$0xff]  ;;  %v261_v25 = vld [vmem:[%s623_s26 + $0x148] sm:$0xff] }
  0x1f   : > { %316 = vmatpush.msra.mxu1 %v249_v13  ;;  %357 = vmatpush.msra.mxu3 %v280_v14  ;;  %v246_v24 = vld [vmem:[%s623_s26 + $0xd0] sm:$0xff]  ;;  %v277_v26 = vld [vmem:[%s623_s26 + $0x1c8] sm:$0xff]  ;;  %v260_v29 = vld [vmem:[%s623_s26 + $0x140] sm:$0xff] }
  0x20   : > { %297 = vmatpush.msra.mxu0 %v232_v15  ;;  %338 = vmatpush.msra.mxu2 %v263_v17  ;;  %v229_v27 = vld [vmem:[%s623_s26 + $0x48] sm:$0xff]  ;;  %v276_v30 = vld [vmem:[%s623_s26 + $0x1c0] sm:$0xff]  ;;  %v259_v33 = vld [vmem:[%s623_s26 + $0x138] sm:$0xff] }
  0x21   : > { %317 = vmatpush.msra.mxu1 %v248_v16  ;;  %358 = vmatpush.msra.mxu3 %v279_v18  ;;  %v245_v28 = vld [vmem:[%s623_s26 + $0xc8] sm:$0xff]  ;;  %v228_v31 = vld [vmem:[%s623_s26 + $0x40] sm:$0xff]  ;;  %v275_v34 = vld [vmem:[%s623_s26 + $0x1b8] sm:$0xff] }
  0x22   : > { %298 = vmatpush.msra.mxu0 %v231_v19  ;;  %339 = vmatpush.msra.mxu2 %v262_v21  ;;  %v244_v32 = vld [vmem:[%s623_s26 + $0xc0] sm:$0xff]  ;;  %v227_v35 = vld [vmem:[%s623_s26 + $0x38] sm:$0xff]  ;;  %v258_v37 = vld [vmem:[%s623_s26 + $0x130] sm:$0xff] }
  0x23   : > { %318 = vmatpush.msra.mxu1 %v247_v20  ;;  %359 = vmatpush.msra.mxu3 %v278_v22  ;;  %v243_v36 = vld [vmem:[%s623_s26 + $0xb8] sm:$0xff]  ;;  %v274_v38 = vld [vmem:[%s623_s26 + $0x1b0] sm:$0xff]  ;;  %v257_v41 = vld [vmem:[%s623_s26 + $0x128] sm:$0xff] }
  0x24   : > { %299 = vmatpush.msra.mxu0 %v230_v23  ;;  %340 = vmatpush.msra.mxu2 %v261_v25  ;;  %v226_v39 = vld [vmem:[%s623_s26 + $0x30] sm:$0xff]  ;;  %v273_v42 = vld [vmem:[%s623_s26 + $0x1a8] sm:$0xff]  ;;  %v219_v45 = vld [vmem:[%s618_s22] sm:$0xff] }
  0x25   : > { %319 = vmatpush.msra.mxu1 %v246_v24  ;;  %360 = vmatpush.msra.mxu3 %v277_v26  ;;  %v242_v40 = vld [vmem:[%s623_s26 + $0xb0] sm:$0xff]  ;;  %v225_v43 = vld [vmem:[%s623_s26 + $0x28] sm:$0xff]  ;;  %v256_v46 = vld [vmem:[%s623_s26 + $0x120] sm:$0xff]  ;;  %285 = vst [vmem:[#allocation1] ss:$4 sm:$0xff] %v219_v45 }
  0x26   : > { %300 = vmatpush.msra.mxu0 %v229_v27  ;;  %341 = vmatpush.msra.mxu2 %v260_v29  ;;  %v241_v44 = vld [vmem:[%s623_s26 + $0xa8] sm:$0xff]  ;;  %v272_v47 = vld [vmem:[%s623_s26 + $0x1a0] sm:$0xff]  ;;  %v255_v50 = vld [vmem:[%s623_s26 + $0x118] sm:$0xff] }
  0x27   : > { %320 = vmatpush.msra.mxu1 %v245_v28  ;;  %361 = vmatpush.msra.mxu3 %v276_v30  ;;  %v224_v48 = vld [vmem:[%s623_s26 + $0x20] sm:$0xff]  ;;  %v271_v51 = vld [vmem:[%s623_s26 + $0x198] sm:$0xff]  ;;  %v254_v54 = vld [vmem:[%s623_s26 + $0x110] sm:$0xff] }
  0x28   : > { %301 = vmatpush.msra.mxu0 %v228_v31  ;;  %342 = vmatpush.msra.mxu2 %v259_v33  ;;  %v240_v49 = vld [vmem:[%s623_s26 + $0xa0] sm:$0xff]  ;;  %v223_v52 = vld [vmem:[%s623_s26 + $0x18] sm:$0xff]  ;;  %v270_v55 = vld [vmem:[%s623_s26 + $0x190] sm:$0xff] }
  0x29   : > { %321 = vmatpush.msra.mxu1 %v244_v32  ;;  %362 = vmatpush.msra.mxu3 %v275_v34  ;;  %v239_v53 = vld [vmem:[%s623_s26 + $0x98] sm:$0xff]  ;;  %v222_v56 = vld [vmem:[%s623_s26 + $0x10] sm:$0xff]  ;;  %v253_v58 = vld [vmem:[%s623_s26 + $0x108] sm:$0xff] }
  0x2a   : > { %302 = vmatpush.msra.mxu0 %v227_v35  ;;  %343 = vmatpush.msra.mxu2 %v258_v37  ;;  %v238_v57 = vld [vmem:[%s623_s26 + $0x90] sm:$0xff]  ;;  %v269_v59 = vld [vmem:[%s623_s26 + $0x188] sm:$0xff]  ;;  %v252_v62 = vld [vmem:[%s623_s26 + $0x100] sm:$0xff] }
  0x2b   : > { %322 = vmatpush.msra.mxu1 %v243_v36  ;;  %363 = vmatpush.msra.mxu3 %v274_v38  ;;  %v221_v60 = vld [vmem:[%s623_s26 + $0x8] sm:$0xff]  ;;  %v268_v63 = vld [vmem:[%s623_s26 + $0x180] sm:$0xff] }
  0x2c   : > { %303 = vmatpush.msra.mxu0 %v226_v39  ;;  %344 = vmatpush.msra.mxu2 %v257_v41  ;;  %v237_v61 = vld [vmem:[%s623_s26 + $0x88] sm:$0xff]  ;;  %v288_v0 = vld.sshfl [vmem:[#allocation1 + $0x10] sm:$0xff pattern:$0x73625140]  ;;  %v220_v2 = vld [vmem:[%s623_s26] sm:$0xff] }
  0x2d   : > { %323 = vmatpush.msra.mxu1 %v242_v40  ;;  %364 = vmatpush.msra.mxu3 %v273_v42  ;;  %v289_v1 = vld.sshfl [vmem:[#allocation1 + $0x18] sm:$0xff pattern:$0x73625140]  ;;  %v236_v3 = vld [vmem:[%s623_s26 + $0x80] sm:$0xff]  ;;  %v218_v12 = vld [vmem:[#allocation2] sm:$0x3] }
  0x2e   : > { %304 = vmatpush.msra.mxu0 %v225_v43  ;;  %345 = vmatpush.msra.mxu2 %v256_v46  ;;  %v286_v4 = vld.sshfl [vmem:[#allocation1] sm:$0xff pattern:$0x73625140]  ;;  %v287_v5 = vld.sshfl [vmem:[#allocation1 + $0x8] sm:$0xff pattern:$0x73625140] }
  0x2f   : > { %324 = vmatpush.msra.mxu1 %v241_v44  ;;  %365 = vmatpush.msra.mxu3 %v272_v47 }
  0x30   : > { %305 = vmatpush.msra.mxu0 %v224_v48  ;;  %346 = vmatpush.msra.mxu2 %v255_v50 }
  0x31   : > { %325 = vmatpush.msra.mxu1 %v240_v49  ;;  %366 = vmatpush.msra.mxu3 %v271_v51 }
  0x32   : > { %306 = vmatpush.msra.mxu0 %v223_v52  ;;  %347 = vmatpush.msra.mxu2 %v254_v54 }
  0x33   : > { %326 = vmatpush.msra.mxu1 %v239_v53  ;;  %367 = vmatpush.msra.mxu3 %v270_v55 }
  0x34   : > { %307 = vmatpush.msra.mxu0 %v222_v56  ;;  %348 = vmatpush.msra.mxu2 %v253_v58 }
  0x35   : > { %327 = vmatpush.msra.mxu1 %v238_v57  ;;  %368 = vmatpush.msra.mxu3 %v269_v59 }
  0x36   : > { %308 = vmatpush.msra.mxu0 %v221_v60  ;;  %349 = vmatpush.msra.mxu2 %v252_v62 }
  0x37   : > { %328 = vmatpush.msra.mxu1 %v237_v61  ;;  %369 = vmatpush.msra.mxu3 %v268_v63 }
  0x38   : > { %350 = vmatmul.f32.vlgmr.msra.gmra.mxu2 %v288_v0  ;;  %370 = vmatmul.f32.vlgmr.msra.gmra.mxu3 %v289_v1 }
  0x39   : > { %309 = vmatpush.msra.mxu0 %v220_v2  ;;  %329 = vmatpush.msra.mxu1 %v236_v3 }
  0x3a   : > { %310 = vmatmul.f32.vlgmr.msra.gmra.mxu0 %v286_v4  ;;  %330 = vmatmul.f32.vlgmr.msra.gmra.mxu1 %v287_v5 }
  0xb7   : > { %v311_v6 = vpop.f32.mrf.mxu0  ;;  %v331_v7 = vpop.f32.mrf.mxu1 }
  0xb8   : > { %v332_v8 = vadd.f32 %v331_v7, %v311_v6 }
  0xbb   : > { %v351_v9 = vpop.f32.mrf.mxu2  ;;  %v371_v10 = vpop.f32.mrf.mxu3 }
  0xbc   : > { %v352_v11 = vadd.f32 %v351_v9, %v332_v8 }
  0xbe   : > { %v372_v13 = vadd.f32 %v371_v10, %v352_v11  ;;  %380 = sbr.rel (%p476_p7) target bundleno = 205 (0xcd), region = 40 }
  0xc0   : > { %v374_v14 = vadd.f32 %v372_v13, %v218_v12 }
  0xc2   : > { %376 = vst.msk [vmem:[#allocation2] sm:$0x3] %vm375_vm1, %v374_v14 }
  0xc3   : > { %v513_v16 = vld [vmem:[%s711_s2] ss:$0 sm:$0xff] }
  0xc9   : > { %v381_v15 = vld [vmem:[#allocation2] sm:$0x3] }
  0xca   : > { %v386_v17 = vadd.f32 %v513_v16, %v381_v15 }
  0xcc   : > { %387 = vst.msk [vmem:[#allocation3] sm:$0x3] %vm375_vm1, %v386_v17 }
  0xcd PF: > { %p485_p8 = scmp.eq.s32.totalorder %s467_s15, 1  ;;  %s398_s4 = sshll.u32 %s712_s3, 4  ;;  %s399_s4 = int_to_ptr.hbm [resolvable:$true] %s398_s4 }
  0xce   : > { %s571_s5 = smov [#allocation3]  }
  0xcf   : > { %s396_s6 = sshll.u32 %s571_s5, 4  ;;  %s397_s6 = int_to_ptr.vmem [resolvable:$true] %s396_s6 }
  0xd0   : > { %482 = dma.vmem_to_hbm [thread:$0]  (%p485_p8), %s397_s6, 32, %s399_s4, [#allocation4]  }
  0xd1   : > { %555 = dma.done.wait (%p485_p8), [#allocation4], 32  }
  0xd2   : > { %557 = vsyncadd (%p485_p8), [#allocation4], 4294967264 }
  0xd3 PF: > { %s14_s14 = sadd.s32 1, %s568_s14   ;;  %s713_s12 = smov %s564_s13 }
  0xd4   : > { %p11_p9 = scmp.ge.s32.totalorder %s14_s14, 4   ;;  %s714_s13 = smov %s716_s16 }
  0xd6   :  { %13 = sbr.rel (!%p11_p9) target bundleno = 2 (0x2), region = 71 }
  0xdb   :  { %412 = vsyncpa [#allocation4], 1 }
  0xdc   :  { %414 = vsyncpa [#allocation4 + $0x1], 1 }

</bundles_post_ra>
